<compile_context>
chip_gen: v5e
topology: v5e:2x2
jax: 0.10.0
libtpu: 0.0.40
codegen_flags: <defaults>
</compile_context>

<pallas_src>
import functools

import jax
import jax.numpy as jnp
from jax.experimental import pallas as pl
from jax.experimental.pallas import tpu as pltpu


def ann_kernel(x_ref, w1_ref, b1_ref, w2_ref, b2_ref, w3_ref, b3_ref, o_ref):
    # Input arrives in native f32; cast to bf16 on the VPU (hidden under MXU).
    x = x_ref[...].astype(jnp.bfloat16)
    # Layer 1: Linear(D -> 512) + ReLU   (bf16 operands, f32 MXU accumulation)
    h1 = jnp.dot(x, w1_ref[...], preferred_element_type=jnp.float32)
    h1 = jnp.maximum(h1 + b1_ref[...], 0.0).astype(jnp.bfloat16)
    # Layer 2: Linear(512 -> 256) + ReLU
    h2 = jnp.dot(h1, w2_ref[...], preferred_element_type=jnp.float32)
    h2 = jnp.maximum(h2 + b2_ref[...], 0.0).astype(jnp.bfloat16)
    # fc: Linear(256 -> C_pad=128 lanes), no activation; bf16 writeback halves
    # the output HBM bytes (only the first 10 lanes are real logits).
    out = jnp.dot(h2, w3_ref[...], preferred_element_type=jnp.float32) + b3_ref[...]
    o_ref[...] = out.astype(o_ref.dtype)


def _round_up(x, m):
    return (x + m - 1) // m * m


def prepare_params(w1, b1, w2, b2, w3, b3):
    """One-time layout prep: bf16 weights, f32 biases, lane-padded classifier.

    Weights are stored as [in, out] (transposed w.r.t. PyTorch's [out, in]).
    Call once and reuse the returned tuple across forward calls.
    """
    C = w3.shape[1]
    C_pad = max(_round_up(C, 128), 128)
    w3p = jnp.zeros((w3.shape[0], C_pad), jnp.bfloat16).at[:, :C].set(
        w3.astype(jnp.bfloat16))
    b3p = jnp.zeros((1, C_pad), jnp.float32).at[:, :C].set(
        b3.reshape(1, -1).astype(jnp.float32))
    return (
        w1.astype(jnp.bfloat16), b1.reshape(1, -1).astype(jnp.float32),
        w2.astype(jnp.bfloat16), b2.reshape(1, -1).astype(jnp.float32),
        w3p, b3p,
    )


@functools.partial(jax.jit, static_argnames=("out_channel", "tm_max"))
def ann_net_forward(x, params, *, out_channel, tm_max=1024):
    """x: [B, ...] float (flattened to [B, D] like x.view(B, -1))."""
    w1, b1, w2, b2, w3p, b3p = params
    B = x.shape[0]
    x2d = x.reshape(B, -1).astype(jnp.float32)
    D = x2d.shape[1]
    H1 = w1.shape[1]
    H2 = w2.shape[1]
    C_pad = w3p.shape[1]

    # Batch tile: multiple of 8 sublanes, large enough to amortize the
    # ~0.35 us per-grid-step overhead. If the whole batch would fit in one
    # tile but B >= 512, split into 2 tiles (256-multiple) so v7x's two
    # TensorCores both get work via the "parallel" batch axis.
    TM = min(tm_max, _round_up(B, 8))
    if B >= 512 and _round_up(B, TM) == TM:
        TM = _round_up((B + 1) // 2, 256)
    B_pad = _round_up(B, TM)
    if B_pad != B:
        # Inside this jit, the pad fuses with the kernel launch (no extra pass).
        x2d = jnp.pad(x2d, ((0, B_pad - B), (0, 0)))

    grid = (B_pad // TM,)
    const = lambda shape: pl.BlockSpec(shape, lambda i: (0, 0))

    out = pl.pallas_call(
        ann_kernel,
        out_shape=jax.ShapeDtypeStruct((B_pad, C_pad), jnp.bfloat16),
        grid=grid,
        in_specs=[
            pl.BlockSpec((TM, D), lambda i: (i, 0)),  # activations tile over batch
            const((D, H1)),                           # weights/biases VMEM-resident
            const((1, H1)),
            const((H1, H2)),
            const((1, H2)),
            const((H2, C_pad)),
            const((1, C_pad)),
        ],
        out_specs=pl.BlockSpec((TM, C_pad), lambda i: (i, 0)),
        compiler_params=pltpu.CompilerParams(
            dimension_semantics=("parallel",),        # shard batch tiles over 2 TCs (v7x)
            vmem_limit_bytes=32 * 1024 * 1024,        # safe on v5e/v6e/v7x, fits TM=1024
        ),
    )(x2d, w1, b1, w2, b2, w3p, b3p)

    # Slice off batch padding and lane padding; return f32 logits.
    return out[:B, :out_channel].astype(jnp.float32)


if __name__ == "__main__":
    batch = 20            # not a multiple of the tile -> exercises batch padding
    data_length = 256     # args.data_length (no 'FFT' in data_name -> unchanged)
    out_channel = 10

    keys = jax.random.split(jax.random.PRNGKey(0), 7)

    def init_linear(kw, kb, fan_in, fan_out):
        bound = 1.0 / jnp.sqrt(fan_in)
        # stored as [in, out] (transposed w.r.t. PyTorch's [out, in])
        w = jax.random.uniform(kw, (fan_in, fan_out), jnp.float32, -bound, bound)
        b = jax.random.uniform(kb, (1, fan_out), jnp.float32, -bound, bound)
        return w, b

    w1, b1 = init_linear(keys[0], keys[1], data_length, 512)
    w2, b2 = init_linear(keys[2], keys[3], 512, 256)
    w3, b3 = init_linear(keys[4], keys[5], 256, out_channel)

    params = prepare_params(w1, b1, w2, b2, w3, b3)   # one-time, cached

    # Input: raw signal [B, 1, data_length]; forward flattens it (x.view(B, -1)).
    x = jax.random.normal(keys[6], (batch, 1, data_length), jnp.float32)
    x2d = x.reshape(batch, -1)

    # Pure-JAX f32 reference (bf16 weights/activations/output in the kernel).
    ref = jnp.maximum(x2d @ w1 + b1, 0.0)
    ref = jnp.maximum(ref @ w2 + b2, 0.0)
    ref = ref @ w3 + b3

    # Default path (single VMEM-resident batch tile for this small batch).
    out_full = ann_net_forward(x, params, out_channel=out_channel)
    out_full = jax.block_until_ready(out_full)
    assert out_full.shape == (batch, out_channel)
    assert jnp.allclose(out_full, ref, atol=3e-2, rtol=3e-2)

    # Multi-tile path (tm_max=8 -> grid of 3 batch tiles, with padded rows).
    out_tiled = ann_net_forward(x, params, out_channel=out_channel, tm_max=8)
    out_tiled = jax.block_until_ready(out_tiled)
    assert out_tiled.shape == (batch, out_channel)
    assert jnp.allclose(out_tiled, ref, atol=3e-2, rtol=3e-2)

    print("KERNEL_OK")
</pallas_src>

<mosaic_0001>
module attributes {stable_mosaic.version = 11 : i64} {
  func.func @ann_kernel(%arg0: i32, %arg1: memref<24x256xf32, #tpu.memory_space<vmem>>, %arg2: memref<256x512xbf16, #tpu.memory_space<vmem>>, %arg3: memref<1x512xf32, #tpu.memory_space<vmem>>, %arg4: memref<512x256xbf16, #tpu.memory_space<vmem>>, %arg5: memref<1x256xf32, #tpu.memory_space<vmem>>, %arg6: memref<256x128xbf16, #tpu.memory_space<vmem>>, %arg7: memref<1x128xf32, #tpu.memory_space<vmem>>, %arg8: memref<24x128xbf16, #tpu.memory_space<vmem>>) attributes {dimension_semantics = [#tpu.dimension_semantics<parallel>], iteration_bounds = array<i64: 1>, scalar_prefetch = 0 : i64, scratch_operands = 0 : i64, tpu.core_type = #tpu.core_type<tc>, window_params = [{transform_indices = @transform_0, window_bounds = array<i64: 24, 256>}, {pipeline_mode = #tpu.pipeline_mode<synchronous>, transform_indices = @transform_1, window_bounds = array<i64: 256, 512>}, {pipeline_mode = #tpu.pipeline_mode<synchronous>, transform_indices = @transform_2, window_bounds = array<i64: 1, 512>}, {pipeline_mode = #tpu.pipeline_mode<synchronous>, transform_indices = @transform_3, window_bounds = array<i64: 512, 256>}, {pipeline_mode = #tpu.pipeline_mode<synchronous>, transform_indices = @transform_4, window_bounds = array<i64: 1, 256>}, {pipeline_mode = #tpu.pipeline_mode<synchronous>, transform_indices = @transform_5, window_bounds = array<i64: 256, 128>}, {pipeline_mode = #tpu.pipeline_mode<synchronous>, transform_indices = @transform_6, window_bounds = array<i64: 1, 128>}, {transform_indices = @transform_7, window_bounds = array<i64: 24, 128>}]} {
    %c0 = arith.constant 0 : index
    %c0_0 = arith.constant 0 : index
    %0 = vector.load %arg1[%c0, %c0_0] : memref<24x256xf32, #tpu.memory_space<vmem>>, vector<24x256xf32>
    %1 = arith.truncf %0 : vector<24x256xf32> to vector<24x256xbf16>
    %c0_1 = arith.constant 0 : index
    %c0_2 = arith.constant 0 : index
    %2 = vector.load %arg2[%c0_1, %c0_2] : memref<256x512xbf16, #tpu.memory_space<vmem>>, vector<256x512xbf16>
    %cst = arith.constant dense<0.000000e+00> : vector<24x512xf32>
    %3 = tpu.matmul %1, %2, %cst {dimension_numbers = #tpu.dot_dimension_numbers<[1], [0], [0], [1], [0, 0, 1, 1], [], []>} : vector<24x256xbf16>, vector<256x512xbf16>, vector<24x512xf32> -> vector<24x512xf32>
    %c0_3 = arith.constant 0 : index
    %c0_4 = arith.constant 0 : index
    %4 = vector.load %arg3[%c0_3, %c0_4] : memref<1x512xf32, #tpu.memory_space<vmem>>, vector<1x512xf32>
    %5 = vector.broadcast %4 : vector<1x512xf32> to vector<24x512xf32>
    %6 = arith.addf %3, %5 : vector<24x512xf32>
    %cst_5 = arith.constant 0.000000e+00 : f32
    %7 = vector.broadcast %cst_5 : f32 to vector<24x512xf32>
    %8 = arith.maximumf %6, %7 : vector<24x512xf32>
    %9 = arith.truncf %8 : vector<24x512xf32> to vector<24x512xbf16>
    %c0_6 = arith.constant 0 : index
    %c0_7 = arith.constant 0 : index
    %10 = vector.load %arg4[%c0_6, %c0_7] : memref<512x256xbf16, #tpu.memory_space<vmem>>, vector<512x256xbf16>
    %cst_8 = arith.constant dense<0.000000e+00> : vector<24x256xf32>
    %11 = tpu.matmul %9, %10, %cst_8 {dimension_numbers = #tpu.dot_dimension_numbers<[1], [0], [0], [1], [0, 0, 1, 1], [], []>} : vector<24x512xbf16>, vector<512x256xbf16>, vector<24x256xf32> -> vector<24x256xf32>
    %c0_9 = arith.constant 0 : index
    %c0_10 = arith.constant 0 : index
    %12 = vector.load %arg5[%c0_9, %c0_10] : memref<1x256xf32, #tpu.memory_space<vmem>>, vector<1x256xf32>
    %13 = vector.broadcast %12 : vector<1x256xf32> to vector<24x256xf32>
    %14 = arith.addf %11, %13 : vector<24x256xf32>
    %cst_11 = arith.constant 0.000000e+00 : f32
    %15 = vector.broadcast %cst_11 : f32 to vector<24x256xf32>
    %16 = arith.maximumf %14, %15 : vector<24x256xf32>
    %17 = arith.truncf %16 : vector<24x256xf32> to vector<24x256xbf16>
    %c0_12 = arith.constant 0 : index
    %c0_13 = arith.constant 0 : index
    %18 = vector.load %arg6[%c0_12, %c0_13] : memref<256x128xbf16, #tpu.memory_space<vmem>>, vector<256x128xbf16>
    %cst_14 = arith.constant dense<0.000000e+00> : vector<24x128xf32>
    %19 = tpu.matmul %17, %18, %cst_14 {dimension_numbers = #tpu.dot_dimension_numbers<[1], [0], [0], [1], [0, 0, 1, 1], [], []>} : vector<24x256xbf16>, vector<256x128xbf16>, vector<24x128xf32> -> vector<24x128xf32>
    %c0_15 = arith.constant 0 : index
    %c0_16 = arith.constant 0 : index
    %20 = vector.load %arg7[%c0_15, %c0_16] : memref<1x128xf32, #tpu.memory_space<vmem>>, vector<1x128xf32>
    %21 = vector.broadcast %20 : vector<1x128xf32> to vector<24x128xf32>
    %22 = arith.addf %19, %21 : vector<24x128xf32>
    %23 = arith.truncf %22 : vector<24x128xf32> to vector<24x128xbf16>
    %c0_17 = arith.constant 0 : index
    %c0_18 = arith.constant 0 : index
    %24 = vector.load %arg8[%c0_17, %c0_18] : memref<24x128xbf16, #tpu.memory_space<vmem>>, vector<24x128xbf16>
    tpu.vector_store %arg8[%c0_17, %c0_18], %23 {strides = array<i32>} : memref<24x128xbf16, #tpu.memory_space<vmem>>, vector<24x128xbf16>,
    return
  }
  func.func @transform_0(%arg0: i32) -> (i32, i32) {
    %c0_i32 = arith.constant 0 : i32
    %c0_i32_0 = arith.constant 0 : i32
    return %arg0, %c0_i32 : i32, i32
  }
  func.func @transform_1(%arg0: i32) -> (i32, i32) {
    %c0_i32 = arith.constant 0 : i32
    %c0_i32_0 = arith.constant 0 : i32
    %c0_i32_1 = arith.constant 0 : i32
    return %c0_i32, %c0_i32_0 : i32, i32
  }
  func.func @transform_2(%arg0: i32) -> (i32, i32) {
    %c0_i32 = arith.constant 0 : i32
    %c0_i32_0 = arith.constant 0 : i32
    %c0_i32_1 = arith.constant 0 : i32
    return %c0_i32, %c0_i32_0 : i32, i32
  }
  func.func @transform_3(%arg0: i32) -> (i32, i32) {
    %c0_i32 = arith.constant 0 : i32
    %c0_i32_0 = arith.constant 0 : i32
    %c0_i32_1 = arith.constant 0 : i32
    return %c0_i32, %c0_i32_0 : i32, i32
  }
  func.func @transform_4(%arg0: i32) -> (i32, i32) {
    %c0_i32 = arith.constant 0 : i32
    %c0_i32_0 = arith.constant 0 : i32
    %c0_i32_1 = arith.constant 0 : i32
    return %c0_i32, %c0_i32_0 : i32, i32
  }
  func.func @transform_5(%arg0: i32) -> (i32, i32) {
    %c0_i32 = arith.constant 0 : i32
    %c0_i32_0 = arith.constant 0 : i32
    %c0_i32_1 = arith.constant 0 : i32
    return %c0_i32, %c0_i32_0 : i32, i32
  }
  func.func @transform_6(%arg0: i32) -> (i32, i32) {
    %c0_i32 = arith.constant 0 : i32
    %c0_i32_0 = arith.constant 0 : i32
    %c0_i32_1 = arith.constant 0 : i32
    return %c0_i32, %c0_i32_0 : i32, i32
  }
  func.func @transform_7(%arg0: i32) -> (i32, i32) {
    %c0_i32 = arith.constant 0 : i32
    %c0_i32_0 = arith.constant 0 : i32
    return %arg0, %c0_i32 : i32, i32
  }
}

</mosaic_0001>

<bundles_post_ra>
// kernel: ann_net_forward.1
= control target key start
LH: loop header
LB: loop body
LE: loop exit
PB: predicated region body
PF: predicated region fallthrough
CT: control target
= control target key end

     0   :  { %12 = vsyncpa [#allocation3], 0  ;;  %s2339_s0 = inlined_call_operand.vmem [shape: f32[24,256], index: 0, kind: input, shape index: {}]   ;;  %s2340_s1 = inlined_call_operand.hbm [shape: bf16[256,512], index: 1, kind: input, shape index: {}]   ;;  %s2341_s2 = inlined_call_operand.vmem [shape: f32[1,512], index: 2, kind: input, shape index: {}]   ;;  %s2342_s3 = inlined_call_operand.hbm [shape: bf16[512,256], index: 3, kind: input, shape index: {}]   ;;  %s2343_s4 = inlined_call_operand.vmem [shape: f32[1,256], index: 4, kind: input, shape index: {}]   ;;  %s2344_s5 = inlined_call_operand.vmem [shape: bf16[256,128], index: 5, kind: input, shape index: {}]   ;;  %s2345_s6 = inlined_call_operand.vmem [shape: f32[1,128], index: 6, kind: input, shape index: {}]   ;;  %s2346_s7 = inlined_call_operand.vmem [shape: bf16[24,128], index: 7, kind: output, shape index: {}]  }
   0x1   :  { %s20_s26 = sshll.u32 %s2340_s1, 4  ;;  %s21_s26 = int_to_ptr.hbm [resolvable:$true] %s20_s26 }
   0x2   :  { %13 = vsyncpa [#allocation5], 0  ;;  %s2150_s27 = smov [#allocation2]   ;;  %s35_s8 = sshll.u32 %s2342_s3, 4  ;;  %s36_s8 = int_to_ptr.hbm [resolvable:$true] %s35_s8 }
   0x3   :  { %s22_s28 = sshll.u32 %s2150_s27, 4  ;;  %s2151_s9 = smov 256   ;;  %s23_s28 = int_to_ptr.vmem [resolvable:$true] %s22_s28 }
   0x4   :  { %s2152_s10 = smov 16   ;;  %s2153_s11 = smov [#allocation4]  }
   0x5   :  { %28 = dma.hbm_to_vmem [thread:$0]  %s21_s26, 8192, %s23_s28, [#allocation3], %s2151_s9, %s2151_s9, %s2152_s10  }
   0x6   :  { %s37_s12 = sshll.u32 %s2153_s11, 4  ;;  %s2154_s13 = smov 128   ;;  %s38_s12 = int_to_ptr.vmem [resolvable:$true] %s37_s12 }
   0x7   :  { %s2155_s14 = smov 8  }
   0x8   :  { %43 = dma.hbm_to_vmem [thread:$0]  %s36_s8, 8192, %s38_s12, [#allocation5], %s2154_s13, %s2154_s13, %s2155_s14  }
   0x9   :  { %2146 = dma.done.wait [#allocation3], 8192  }
   0xa   :  { %2147 = vsyncadd [#allocation3], 4294959104 }
   0xb   :  { %2148 = dma.done.wait [#allocation5], 8192  }
   0xc   :  { %2149 = vsyncadd [#allocation5], 4294959104  ;;  %v1464_v0 = vld [vmem:[#allocation2 + $0xe0] sm:$0xf]  ;;  %v1956_v1 = vld [vmem:[#allocation2 + $0xec] sm:$0xf0] }
   0xd   :  { %v1592_v2 = vld [vmem:[#allocation2 + $0x1e0] sm:$0xf]  ;;  %v1465_v3 = vor.u32 %v1956_v1, %v1464_v0  ;;  %v1988_v4 = vld [vmem:[#allocation2 + $0x1ec] sm:$0xf0]  ;;  %v1954_v5 = vld [vmem:[#allocation2 + $0xe4] sm:$0xf] }
   0xe   :  { %v1466_v6 = vld [vmem:[#allocation2 + $0xf0] sm:$0xf0]  ;;  %v1593_v7 = vor.u32 %v1988_v4, %v1592_v2  ;;  %v1986_v9 = vld [vmem:[#allocation2 + $0x1e4] sm:$0xf]  ;;  %v1448_v11 = vld [vmem:[#allocation2 + $0xc0] sm:$0xf] }
   0xf   :  { %v1469_v8 = vor.u32 %v1954_v5, %v1466_v6  ;;  %v1594_v10 = vld [vmem:[#allocation2 + $0x1f0] sm:$0xf0]  ;;  %462 = vmatpush.bf16.msra.mxu0 %v1465_v3  ;;  %v1952_v13 = vld [vmem:[#allocation2 + $0xcc] sm:$0xf0]  ;;  %v1576_v14 = vld [vmem:[#allocation2 + $0x1c0] sm:$0xf] }
  0x10   :  { %v1597_v12 = vor.u32 %v1986_v9, %v1594_v10  ;;  %v1984_v15 = vld [vmem:[#allocation2 + $0x1cc] sm:$0xf0]  ;;  %480 = vmatpush.bf16.msra.mxu1 %v1593_v7  ;;  %v1449_v16 = vor.u32 %v1952_v13, %v1448_v11  ;;  %v1950_v18 = vld [vmem:[#allocation2 + $0xc4] sm:$0xf]  ;;  %v1450_v19 = vld [vmem:[#allocation2 + $0xd0] sm:$0xf0] }
  0x11   :  { %498 = vmatpush.bf16.msra.mxu2 %v1469_v8  ;;  %v1577_v17 = vor.u32 %v1984_v15, %v1576_v14  ;;  %v1982_v20 = vld [vmem:[#allocation2 + $0x1c4] sm:$0xf]  ;;  %v1453_v21 = vor.u32 %v1950_v18, %v1450_v19  ;;  %v1578_v22 = vld [vmem:[#allocation2 + $0x1d0] sm:$0xf0]  ;;  %v1432_v23 = vld [vmem:[#allocation2 + $0xa0] sm:$0xf] }
  0x12   :  { %516 = vmatpush.bf16.msra.mxu3 %v1597_v12  ;;  %v1948_v24 = vld [vmem:[#allocation2 + $0xac] sm:$0xf0]  ;;  %v1581_v25 = vor.u32 %v1982_v20, %v1578_v22  ;;  %v1560_v26 = vld [vmem:[#allocation2 + $0x1a0] sm:$0xf]  ;;  %v1946_v28 = vld [vmem:[#allocation2 + $0xa4] sm:$0xf] }
  0x13   :  { %v1980_v27 = vld [vmem:[#allocation2 + $0x1ac] sm:$0xf0]  ;;  %463 = vmatpush.bf16.msra.mxu0 %v1449_v16  ;;  %v1433_v29 = vor.u32 %v1948_v24, %v1432_v23  ;;  %v1434_v30 = vld [vmem:[#allocation2 + $0xb0] sm:$0xf0]  ;;  %v1978_v31 = vld [vmem:[#allocation2 + $0x1a4] sm:$0xf] }
  0x14   :  { %v1562_v32 = vld [vmem:[#allocation2 + $0x1b0] sm:$0xf0]  ;;  %481 = vmatpush.bf16.msra.mxu1 %v1577_v17  ;;  %v1561_v33 = vor.u32 %v1980_v27, %v1560_v26  ;;  %v1437_v34 = vor.u32 %v1946_v28, %v1434_v30  ;;  %v1416_v35 = vld [vmem:[#allocation2 + $0x80] sm:$0xf]  ;;  %v1944_v36 = vld [vmem:[#allocation2 + $0x8c] sm:$0xf0] }
  0x15   :  { %499 = vmatpush.bf16.msra.mxu2 %v1453_v21  ;;  %v1544_v37 = vld [vmem:[#allocation2 + $0x180] sm:$0xf]  ;;  %v1565_v38 = vor.u32 %v1978_v31, %v1562_v32  ;;  %v1976_v39 = vld [vmem:[#allocation2 + $0x18c] sm:$0xf0]  ;;  %v1942_v40 = vld [vmem:[#allocation2 + $0x84] sm:$0xf]  ;;  %v1417_v44 = vor.u32 %v1944_v36, %v1416_v35 }
  0x16   :  { %517 = vmatpush.bf16.msra.mxu3 %v1581_v25  ;;  %v1418_v41 = vld [vmem:[#allocation2 + $0x90] sm:$0xf0]  ;;  %v1974_v42 = vld [vmem:[#allocation2 + $0x184] sm:$0xf]  ;;  %v1545_v45 = vor.u32 %v1976_v39, %v1544_v37  ;;  %v1400_v47 = vld [vmem:[#allocation2 + $0x60] sm:$0xf] }
  0x17   :  { %v1546_v43 = vld [vmem:[#allocation2 + $0x190] sm:$0xf0]  ;;  %464 = vmatpush.bf16.msra.mxu0 %v1433_v29  ;;  %v1421_v46 = vor.u32 %v1942_v40, %v1418_v41  ;;  %v1940_v48 = vld [vmem:[#allocation2 + $0x6c] sm:$0xf0]  ;;  %v1528_v49 = vld [vmem:[#allocation2 + $0x160] sm:$0xf] }
  0x18   :  { %482 = vmatpush.bf16.msra.mxu1 %v1561_v33  ;;  %v1549_v50 = vor.u32 %v1974_v42, %v1546_v43  ;;  %v1972_v51 = vld [vmem:[#allocation2 + $0x16c] sm:$0xf0]  ;;  %v1938_v52 = vld [vmem:[#allocation2 + $0x64] sm:$0xf]  ;;  %v1402_v53 = vld [vmem:[#allocation2 + $0x70] sm:$0xf0]  ;;  %v1401_v56 = vor.u32 %v1940_v48, %v1400_v47 }
  0x19   :  { %500 = vmatpush.bf16.msra.mxu2 %v1437_v34  ;;  %v1970_v54 = vld [vmem:[#allocation2 + $0x164] sm:$0xf]  ;;  %v1530_v55 = vld [vmem:[#allocation2 + $0x170] sm:$0xf0]  ;;  %v1529_v57 = vor.u32 %v1972_v51, %v1528_v49  ;;  %v1405_v58 = vor.u32 %v1938_v52, %v1402_v53  ;;  %v1384_v59 = vld [vmem:[#allocation2 + $0x40] sm:$0xf] }
  0x1a   :  { %518 = vmatpush.bf16.msra.mxu3 %v1565_v38  ;;  %v1936_v60 = vld [vmem:[#allocation2 + $0x4c] sm:$0xf0]  ;;  %v1512_v61 = vld [vmem:[#allocation2 + $0x140] sm:$0xf]  ;;  %v1533_v62 = vor.u32 %v1970_v54, %v1530_v55  ;;  %v1934_v0 = vld [vmem:[#allocation2 + $0x44] sm:$0xf] }
  0x1b   :  { %465 = vmatpush.bf16.msra.mxu0 %v1417_v44  ;;  %v1968_v63 = vld [vmem:[#allocation2 + $0x14c] sm:$0xf0]  ;;  %v1386_v1 = vld [vmem:[#allocation2 + $0x50] sm:$0xf0]  ;;  %v1966_v2 = vld [vmem:[#allocation2 + $0x144] sm:$0xf]  ;;  %v1385_v4 = vor.u32 %v1936_v60, %v1384_v59 }
  0x1c   :  { %483 = vmatpush.bf16.msra.mxu1 %v1545_v45  ;;  %v1514_v3 = vld [vmem:[#allocation2 + $0x150] sm:$0xf0]  ;;  %v1513_v5 = vor.u32 %v1968_v63, %v1512_v61  ;;  %v1389_v6 = vor.u32 %v1934_v0, %v1386_v1  ;;  %v1368_v7 = vld [vmem:[#allocation2 + $0x20] sm:$0xf]  ;;  %v1932_v8 = vld [vmem:[#allocation2 + $0x2c] sm:$0xf0] }
  0x1d   :  { %501 = vmatpush.bf16.msra.mxu2 %v1421_v46  ;;  %v1496_v9 = vld [vmem:[#allocation2 + $0x120] sm:$0xf]  ;;  %v1517_v10 = vor.u32 %v1966_v2, %v1514_v3  ;;  %v1964_v11 = vld [vmem:[#allocation2 + $0x12c] sm:$0xf0]  ;;  %v1930_v12 = vld [vmem:[#allocation2 + $0x24] sm:$0xf]  ;;  %v1369_v16 = vor.u32 %v1932_v8, %v1368_v7 }
  0x1e   :  { %519 = vmatpush.bf16.msra.mxu3 %v1549_v50  ;;  %v1370_v13 = vld [vmem:[#allocation2 + $0x30] sm:$0xf0]  ;;  %v1962_v14 = vld [vmem:[#allocation2 + $0x124] sm:$0xf]  ;;  %v1352_v17 = vld [vmem:[#allocation2] sm:$0xf]  ;;  %v1497_v19 = vor.u32 %v1964_v11, %v1496_v9 }
  0x1f   :  { %466 = vmatpush.bf16.msra.mxu0 %v1401_v56  ;;  %v1498_v15 = vld [vmem:[#allocation2 + $0x130] sm:$0xf0]  ;;  %v1928_v18 = vld [vmem:[#allocation2 + $0xc] sm:$0xf0]  ;;  %v1373_v20 = vor.u32 %v1930_v12, %v1370_v13  ;;  %v1480_v21 = vld [vmem:[#allocation2 + $0x100] sm:$0xf] }
  0x20   :  { %484 = vmatpush.bf16.msra.mxu1 %v1529_v57  ;;  %v1960_v22 = vld [vmem:[#allocation2 + $0x10c] sm:$0xf0]  ;;  %v1926_v23 = vld [vmem:[#allocation2 + $0x4] sm:$0xf]  ;;  %v1501_v24 = vor.u32 %v1962_v14, %v1498_v15  ;;  %v1354_v25 = vld [vmem:[#allocation2 + $0x10] sm:$0xf0]  ;;  %v1353_v31 = vor.u32 %v1928_v18, %v1352_v17 }
  0x21   :  { %502 = vmatpush.bf16.msra.mxu2 %v1405_v58  ;;  %v1958_v26 = vld [vmem:[#allocation2 + $0x104] sm:$0xf]  ;;  %v1482_v27 = vld [vmem:[#allocation2 + $0x110] sm:$0xf0]  ;;  %v1955_v29 = vld [vmem:[#allocation2 + $0xec] sm:$0xf]  ;;  %v1481_v35 = vor.u32 %v1960_v22, %v1480_v21  ;;  %v1357_v36 = vor.u32 %v1926_v23, %v1354_v25 }
  0x22   :  { %520 = vmatpush.bf16.msra.mxu3 %v1533_v62  ;;  %v58_v28 = vld [vmem:[%s2339_s0] sm:$0xff]  ;;  %v1474_v30 = vld [vmem:[#allocation2 + $0xf8] sm:$0xf0]  ;;  %v60_v32 = vld [vmem:[%s2339_s0 + $0x10] sm:$0xff]  ;;  %v1485_v39 = vor.u32 %v1958_v26, %v1482_v27 }
  0x23   :  { %467 = vmatpush.bf16.msra.mxu0 %v1385_v4  ;;  %v1600_v33 = vld [vmem:[#allocation2 + $0x1e8] sm:$0xf]  ;;  %v1989_v34 = vld [vmem:[#allocation2 + $0x1f4] sm:$0xf0]  ;;  %v1477_v40 = vor.u32 %v1955_v29, %v1474_v30  ;;  %v1987_v43 = vld [vmem:[#allocation2 + $0x1ec] sm:$0xf]  ;;  %v2214_v44 = vpack.c.bf16 %v60_v32, %v58_v28 }
  0x24   :  { %485 = vmatpush.bf16.msra.mxu1 %v1513_v5  ;;  %v59_v37 = vld [vmem:[%s2339_s0 + $0x8] sm:$0xff]  ;;  %v61_v38 = vld [vmem:[%s2339_s0 + $0x18] sm:$0xff]  ;;  %v1601_v45 = vor.u32 %v1989_v34, %v1600_v33  ;;  %v62_v22 = vld [vmem:[%s2339_s0 + $0x20] sm:$0xff] }
  0x25   :  { %503 = vmatpush.bf16.msra.mxu2 %v1389_v6  ;;  %v1472_v41 = vld [vmem:[#allocation2 + $0xe8] sm:$0xf]  ;;  %v1957_v42 = vld [vmem:[#allocation2 + $0xf4] sm:$0xf0]  ;;  %v1602_v46 = vld [vmem:[#allocation2 + $0x1f8] sm:$0xf0]  ;;  %v2216_v49 = vpack.c.bf16 %v61_v38, %v59_v37  ;;  %v2228_v32 = vpack.c.bf16 %v62_v22, %v62_v22 }
  0x26   :  { %521 = vmatpush.bf16.msra.mxu3 %v1517_v10  ;;  %v1951_v47 = vld [vmem:[#allocation2 + $0xcc] sm:$0xf]  ;;  %v1458_v48 = vld [vmem:[#allocation2 + $0xd8] sm:$0xf0]  ;;  %v1584_v50 = vld [vmem:[#allocation2 + $0x1c8] sm:$0xf]  ;;  %v1473_v52 = vor.u32 %v1957_v42, %v1472_v41  ;;  %v1605_v53 = vor.u32 %v1987_v43, %v1602_v46 }
  0x27   :  { %468 = vmatpush.bf16.msra.mxu0 %v1369_v16  ;;  %v1985_v51 = vld [vmem:[#allocation2 + $0x1d4] sm:$0xf0]  ;;  %v1461_v54 = vor.u32 %v1951_v47, %v1458_v48  ;;  %v1456_v55 = vld [vmem:[#allocation2 + $0xc8] sm:$0xf]  ;;  %v1983_v57 = vld [vmem:[#allocation2 + $0x1cc] sm:$0xf] }
  0x28   :  { %486 = vmatpush.bf16.msra.mxu1 %v1497_v19  ;;  %v1953_v56 = vld [vmem:[#allocation2 + $0xd4] sm:$0xf0]  ;;  %v1585_v58 = vor.u32 %v1985_v51, %v1584_v50  ;;  %v1586_v59 = vld [vmem:[#allocation2 + $0x1d8] sm:$0xf0]  ;;  %v1947_v60 = vld [vmem:[#allocation2 + $0xac] sm:$0xf] }
  0x29   :  { %504 = vmatpush.bf16.msra.mxu2 %v1373_v20  ;;  %v1442_v61 = vld [vmem:[#allocation2 + $0xb8] sm:$0xf0]  ;;  %v1568_v62 = vld [vmem:[#allocation2 + $0x1a8] sm:$0xf]  ;;  %v1981_v63 = vld [vmem:[#allocation2 + $0x1b4] sm:$0xf0]  ;;  %v1457_v0 = vor.u32 %v1953_v56, %v1456_v55  ;;  %v1589_v1 = vor.u32 %v1983_v57, %v1586_v59 }
  0x2a   :  { %522 = vmatpush.bf16.msra.mxu3 %v1501_v24  ;;  %v1445_v2 = vor.u32 %v1947_v60, %v1442_v61  ;;  %v1440_v3 = vld [vmem:[#allocation2 + $0xa8] sm:$0xf]  ;;  %v1949_v4 = vld [vmem:[#allocation2 + $0xb4] sm:$0xf0]  ;;  %v1979_v5 = vld [vmem:[#allocation2 + $0x1ac] sm:$0xf]  ;;  %v1569_v6 = vor.u32 %v1981_v63, %v1568_v62 }
  0x2b   :  { %469 = vmatpush.bf16.msra.mxu0 %v1353_v31  ;;  %v1570_v7 = vld [vmem:[#allocation2 + $0x1b8] sm:$0xf0]  ;;  %v1943_v8 = vld [vmem:[#allocation2 + $0x8c] sm:$0xf]  ;;  %v1552_v10 = vld [vmem:[#allocation2 + $0x188] sm:$0xf]  ;;  %v1441_v12 = vor.u32 %v1949_v4, %v1440_v3 }
  0x2c   :  { %487 = vmatpush.bf16.msra.mxu1 %v1481_v35  ;;  %v1426_v9 = vld [vmem:[#allocation2 + $0x98] sm:$0xf0]  ;;  %v1977_v11 = vld [vmem:[#allocation2 + $0x194] sm:$0xf0]  ;;  %v1573_v13 = vor.u32 %v1979_v5, %v1570_v7  ;;  %v1424_v15 = vld [vmem:[#allocation2 + $0x88] sm:$0xf] }
  0x2d   :  { %505 = vmatpush.bf16.msra.mxu2 %v1357_v36  ;;  %v1429_v14 = vor.u32 %v1943_v8, %v1426_v9  ;;  %v1945_v16 = vld [vmem:[#allocation2 + $0x94] sm:$0xf0]  ;;  %v1975_v17 = vld [vmem:[#allocation2 + $0x18c] sm:$0xf]  ;;  %v1553_v18 = vor.u32 %v1977_v11, %v1552_v10  ;;  %v1554_v19 = vld [vmem:[#allocation2 + $0x198] sm:$0xf0] }
  0x2e   :  { %523 = vmatpush.bf16.msra.mxu3 %v1485_v39  ;;  %470 = vmatmul.bf16.vlgmr.msra.gmra.mxu0 %v2214_v44  ;;  %v1939_v20 = vld [vmem:[#allocation2 + $0x6c] sm:$0xf]  ;;  %v1410_v21 = vld [vmem:[#allocation2 + $0x78] sm:$0xf0]  ;;  %v1536_v23 = vld [vmem:[#allocation2 + $0x168] sm:$0xf]  ;;  %v1425_v25 = vor.u32 %v1945_v16, %v1424_v15  ;;  %v1557_v27 = vor.u32 %v1975_v17, %v1554_v19 }
  0x2f   :  { %488 = vmatmul.bf16.vlgmr.msra.gmra.mxu1 %v2216_v49  ;;  %534 = vmatpush.bf16.msrb.mxu0 %v1473_v52  ;;  %v1973_v24 = vld [vmem:[#allocation2 + $0x174] sm:$0xf0]  ;;  %v63_v26 = vld [vmem:[%s2339_s0 + $0x28] sm:$0xff]  ;;  %v1413_v28 = vor.u32 %v1939_v20, %v1410_v21  ;;  %v1538_v34 = vld [vmem:[#allocation2 + $0x178] sm:$0xf0] }
  0x30   :  { %552 = vmatpush.bf16.msrb.mxu1 %v1601_v45  ;;  %506 = vmatmul.bf16.vlgmr.msra.gmra.mxu2 %v2214_v44  ;;  %v1408_v29 = vld [vmem:[#allocation2 + $0x68] sm:$0xf]  ;;  %v1941_v30 = vld [vmem:[#allocation2 + $0x74] sm:$0xf0]  ;;  %v1971_v31 = vld [vmem:[#allocation2 + $0x16c] sm:$0xf]  ;;  %v1537_v33 = vor.u32 %v1973_v24, %v1536_v23  ;;  %v2230_v37 = vpack.c.bf16 %v63_v26, %v63_v26 }
  0x31   :  { %570 = vmatpush.bf16.msrb.mxu2 %v1477_v40  ;;  %524 = vmatmul.bf16.vlgmr.msra.gmra.mxu3 %v2216_v49  ;;  %v1935_v35 = vld [vmem:[#allocation2 + $0x4c] sm:$0xf]  ;;  %v1394_v36 = vld [vmem:[#allocation2 + $0x58] sm:$0xf0]  ;;  %v1520_v38 = vld [vmem:[#allocation2 + $0x148] sm:$0xf]  ;;  %v1409_v40 = vor.u32 %v1941_v30, %v1408_v29  ;;  %v1541_v41 = vor.u32 %v1971_v31, %v1538_v34 }
  0x32   :  { %588 = vmatpush.bf16.msrb.mxu3 %v1605_v53  ;;  %v1969_v39 = vld [vmem:[#allocation2 + $0x154] sm:$0xf0]  ;;  %v1397_v42 = vor.u32 %v1935_v35, %v1394_v36  ;;  %v1392_v43 = vld [vmem:[#allocation2 + $0x48] sm:$0xf]  ;;  %v1967_v46 = vld [vmem:[#allocation2 + $0x14c] sm:$0xf] }
  0x33   :  { %535 = vmatpush.bf16.msrb.mxu0 %v1457_v0  ;;  %v1937_v45 = vld [vmem:[#allocation2 + $0x54] sm:$0xf0]  ;;  %v1521_v47 = vor.u32 %v1969_v39, %v1520_v38  ;;  %v1522_v48 = vld [vmem:[#allocation2 + $0x158] sm:$0xf0]  ;;  %v1931_v50 = vld [vmem:[#allocation2 + $0x2c] sm:$0xf] }
  0x34   :  { %553 = vmatpush.bf16.msrb.mxu1 %v1585_v58  ;;  %v1378_v51 = vld [vmem:[#allocation2 + $0x38] sm:$0xf0]  ;;  %v1504_v52 = vld [vmem:[#allocation2 + $0x128] sm:$0xf]  ;;  %v1965_v53 = vld [vmem:[#allocation2 + $0x134] sm:$0xf0]  ;;  %v1525_v55 = vor.u32 %v1967_v46, %v1522_v48 }
  0x35   :  { %571 = vmatpush.bf16.msrb.mxu2 %v1461_v54  ;;  %v1393_v54 = vor.u32 %v1937_v45, %v1392_v43  ;;  %v1381_v56 = vor.u32 %v1931_v50, %v1378_v51  ;;  %v1376_v57 = vld [vmem:[#allocation2 + $0x28] sm:$0xf]  ;;  %v1933_v58 = vld [vmem:[#allocation2 + $0x34] sm:$0xf0]  ;;  %v1963_v59 = vld [vmem:[#allocation2 + $0x12c] sm:$0xf]  ;;  %v1505_v60 = vor.u32 %v1965_v53, %v1504_v52 }
  0x36   :  { %589 = vmatpush.bf16.msrb.mxu3 %v1589_v1  ;;  %v1506_v61 = vld [vmem:[#allocation2 + $0x138] sm:$0xf0]  ;;  %v1927_v62 = vld [vmem:[#allocation2 + $0xc] sm:$0xf]  ;;  %v1488_v0 = vld [vmem:[#allocation2 + $0x108] sm:$0xf] }
  0x37   :  { %536 = vmatpush.bf16.msrb.mxu0 %v1441_v12  ;;  %v1362_v63 = vld [vmem:[#allocation2 + $0x18] sm:$0xf0]  ;;  %v1961_v1 = vld [vmem:[#allocation2 + $0x114] sm:$0xf0]  ;;  %v1728_v3 = vld [vmem:[#allocation4 + $0xf0] sm:$0xf]  ;;  %v1509_v5 = vor.u32 %v1963_v59, %v1506_v61 }
  0x38   :  { %554 = vmatpush.bf16.msrb.mxu1 %v1569_v6  ;;  %v2021_v4 = vld [vmem:[#allocation4 + $0xf4] sm:$0xf0]  ;;  %v1365_v6 = vor.u32 %v1927_v62, %v1362_v63  ;;  %v1360_v7 = vld [vmem:[#allocation2 + $0x8] sm:$0xf]  ;;  %v1959_v9 = vld [vmem:[#allocation2 + $0x10c] sm:$0xf]  ;;  %v1489_v10 = vor.u32 %v1961_v1, %v1488_v0 }
  0x39   :  { %572 = vmatpush.bf16.msrb.mxu2 %v1445_v2  ;;  %v1377_v2 = vor.u32 %v1933_v58, %v1376_v57  ;;  %v1929_v8 = vld [vmem:[#allocation2 + $0x14] sm:$0xf0]  ;;  %v1490_v11 = vld [vmem:[#allocation2 + $0x118] sm:$0xf0]  ;;  %v1664_v12 = vld [vmem:[#allocation4 + $0x70] sm:$0xf] }
  0x3a   :  { %590 = vmatpush.bf16.msrb.mxu3 %v1573_v13  ;;  %v2005_v13 = vld [vmem:[#allocation4 + $0x74] sm:$0xf0]  ;;  %v1361_v15 = vor.u32 %v1929_v8, %v1360_v7  ;;  %v1493_v16 = vor.u32 %v1959_v9, %v1490_v11  ;;  %v2003_v19 = vld [vmem:[#allocation4 + $0x64] sm:$0xf0]  ;;  %v1720_v20 = vld [vmem:[#allocation4 + $0xe0] sm:$0xf] }
  0x3b   :  { %537 = vmatpush.bf16.msrb.mxu0 %v1425_v25  ;;  %v1665_v17 = vor.u32 %v2005_v13, %v1664_v12  ;;  %v2019_v21 = vld [vmem:[#allocation4 + $0xe4] sm:$0xf0]  ;;  %v1648_v24 = vld [vmem:[#allocation4 + $0x50] sm:$0xf]  ;;  %v2001_v25 = vld [vmem:[#allocation4 + $0x54] sm:$0xf0] }
  0x3c   :  { %555 = vmatpush.bf16.msrb.mxu1 %v1553_v18  ;;  %v1656_v18 = vld [vmem:[#allocation4 + $0x60] sm:$0xf]  ;;  %v1721_v23 = vor.u32 %v2019_v21, %v1720_v20  ;;  %v1649_v26 = vor.u32 %v2001_v25, %v1648_v24  ;;  %v1712_v30 = vld [vmem:[#allocation4 + $0xd0] sm:$0xf]  ;;  %v2015_v36 = vld [vmem:[#allocation4 + $0xc4] sm:$0xf0] }
  0x3d   :  { %573 = vmatpush.bf16.msrb.mxu2 %v1429_v14  ;;  %v1729_v14 = vor.u32 %v2021_v4, %v1728_v3  ;;  %v1657_v22 = vor.u32 %v2003_v19, %v1656_v18  ;;  %v1704_v35 = vld [vmem:[#allocation4 + $0xc0] sm:$0xf]  ;;  %v2013_v43 = vld [vmem:[#allocation4 + $0xb4] sm:$0xf0]  ;;  %v2011_v48 = vld [vmem:[#allocation4 + $0xa4] sm:$0xf0] }
  0x3e   :  { %591 = vmatpush.bf16.msrb.mxu3 %v1557_v27  ;;  %475 = vmatmul.bf16.gmra.mxu0 %v2228_v32  ;;  %v1640_v27 = vld [vmem:[#allocation4 + $0x40] sm:$0xf]  ;;  %v1705_v38 = vor.u32 %v2015_v36, %v1704_v35  ;;  %v1993_v45 = vld [vmem:[#allocation4 + $0x14] sm:$0xf0]  ;;  %v1991_v52 = vld [vmem:[#allocation4 + $0x4] sm:$0xf0] }
  0x3f   :  { %493 = vmatmul.bf16.gmra.mxu1 %v2230_v37  ;;  %538 = vmatpush.bf16.msrb.mxu0 %v1409_v40  ;;  %v1624_v39 = vld [vmem:[#allocation4 + $0x20] sm:$0xf]  ;;  %v1995_v40 = vld [vmem:[#allocation4 + $0x24] sm:$0xf0]  ;;  %v1792_v57 = vld [vmem:[#allocation4 + $0x170] sm:$0xf] }
  0x40   :  { %556 = vmatpush.bf16.msrb.mxu1 %v1537_v33  ;;  %511 = vmatmul.bf16.gmra.mxu2 %v2228_v32  ;;  %v1997_v33 = vld [vmem:[#allocation4 + $0x34] sm:$0xf0]  ;;  %v1608_v51 = vld [vmem:[#allocation4] sm:$0xf]  ;;  %v2004_v59 = vld [vmem:[#allocation4 + $0x74] sm:$0xf] }
  0x41   :  { %574 = vmatpush.bf16.msrb.mxu2 %v1413_v28  ;;  %529 = vmatmul.bf16.gmra.mxu3 %v2230_v37  ;;  %v1999_v28 = vld [vmem:[#allocation4 + $0x44] sm:$0xf0]  ;;  %v1609_v53 = vor.u32 %v1991_v52, %v1608_v51  ;;  %v2037_v58 = vld [vmem:[#allocation4 + $0x174] sm:$0xf0]  ;;  %v1666_v61 = vld [vmem:[#allocation4 + $0x78] sm:$0xf0] }
  0x42   :  { %592 = vmatpush.bf16.msrb.mxu3 %v1541_v41  ;;  %v1641_v29 = vor.u32 %v1999_v28, %v1640_v27  ;;  %v1625_v41 = vor.u32 %v1995_v40, %v1624_v39  ;;  %v1669_v62 = vor.u32 %v2004_v59, %v1666_v61  ;;  %v1672_v63 = vld [vmem:[#allocation4 + $0x80] sm:$0xf]  ;;  %v2007_v0 = vld [vmem:[#allocation4 + $0x84] sm:$0xf0]  ;;  %v2002_v4 = vld [vmem:[#allocation4 + $0x64] sm:$0xf] }
  0x43   :  { %539 = vmatpush.bf16.msrb.mxu0 %v1393_v54  ;;  %v1680_v54 = vld [vmem:[#allocation4 + $0x90] sm:$0xf]  ;;  %v1673_v1 = vor.u32 %v2007_v0, %v1672_v63  ;;  %v2035_v3 = vld [vmem:[#allocation4 + $0x164] sm:$0xf0]  ;;  %v2053_v9 = vld [vmem:[#allocation4 + $0x1f4] sm:$0xf0] }
  0x44   :  { %557 = vmatpush.bf16.msrb.mxu1 %v1521_v47  ;;  %v1688_v47 = vld [vmem:[#allocation4 + $0xa0] sm:$0xf]  ;;  %v1856_v8 = vld [vmem:[#allocation4 + $0x1f0] sm:$0xf]  ;;  %v1730_v12 = vld [vmem:[#allocation4 + $0xf8] sm:$0xf0] }
  0x45   :  { %575 = vmatpush.bf16.msrb.mxu2 %v1397_v42  ;;  %v1696_v42 = vld [vmem:[#allocation4 + $0xb0] sm:$0xf]  ;;  %v1689_v50 = vor.u32 %v2011_v48, %v1688_v47  ;;  %v1857_v11 = vor.u32 %v2053_v9, %v1856_v8  ;;  %v1650_v18 = vld [vmem:[#allocation4 + $0x58] sm:$0xf0]  ;;  %v1848_v20 = vld [vmem:[#allocation4 + $0x1e0] sm:$0xf] }
  0x46   :  { %593 = vmatpush.bf16.msrb.mxu3 %v1525_v55  ;;  %v2009_v55 = vld [vmem:[#allocation4 + $0x94] sm:$0xf0]  ;;  %v2051_v21 = vld [vmem:[#allocation4 + $0x1e4] sm:$0xf0]  ;;  %v1722_v25 = vld [vmem:[#allocation4 + $0xe8] sm:$0xf0] }
  0x47   :  { %540 = vmatpush.bf16.msrb.mxu0 %v1377_v2  ;;  %v1784_v2 = vld [vmem:[#allocation4 + $0x160] sm:$0xf]  ;;  %v1849_v24 = vor.u32 %v2051_v21, %v1848_v20  ;;  %v2031_v28 = vld [vmem:[#allocation4 + $0x144] sm:$0xf0]  ;;  %v1714_v39 = vld [vmem:[#allocation4 + $0xd8] sm:$0xf0] }
  0x48   :  { %558 = vmatpush.bf16.msrb.mxu1 %v1505_v60  ;;  %v1793_v60 = vor.u32 %v2037_v58, %v1792_v57  ;;  %v1768_v27 = vld [vmem:[#allocation4 + $0x140] sm:$0xf]  ;;  %v2047_v48 = vld [vmem:[#allocation4 + $0x1c4] sm:$0xf0]  ;;  %v1706_v52 = vld [vmem:[#allocation4 + $0xc8] sm:$0xf0] }
  0x49   :  { %576 = vmatpush.bf16.msrb.mxu2 %v1381_v56  ;;  %v1681_v56 = vor.u32 %v2009_v55, %v1680_v54  ;;  %v1832_v47 = vld [vmem:[#allocation4 + $0x1c0] sm:$0xf]  ;;  %v1994_v58 = vld [vmem:[#allocation4 + $0x24] sm:$0xf]  ;;  %v1626_v59 = vld [vmem:[#allocation4 + $0x28] sm:$0xf0] }
  0x4a   :  { %594 = vmatpush.bf16.msrb.mxu3 %v1509_v5  ;;  %v1785_v5 = vor.u32 %v2035_v3, %v1784_v2  ;;  %v1833_v51 = vor.u32 %v2047_v48, %v1832_v47  ;;  %v1752_v55 = vld [vmem:[#allocation4 + $0x120] sm:$0xf]  ;;  %v1629_v61 = vor.u32 %v1994_v58, %v1626_v59  ;;  %v2045_v63 = vld [vmem:[#allocation4 + $0x1b4] sm:$0xf0]  ;;  %v2012_v0 = vld [vmem:[#allocation4 + $0xb4] sm:$0xf] }
  0x4b   :  { %541 = vmatpush.bf16.msrb.mxu0 %v1361_v15  ;;  %v2033_v15 = vld [vmem:[#allocation4 + $0x154] sm:$0xf0]  ;;  %v1794_v47 = vld [vmem:[#allocation4 + $0x178] sm:$0xf0]  ;;  %v1674_v58 = vld [vmem:[#allocation4 + $0x88] sm:$0xf0] }
  0x4c   :  { %559 = vmatpush.bf16.msrb.mxu1 %v1489_v10  ;;  %v2020_v10 = vld [vmem:[#allocation4 + $0xf4] sm:$0xf] }
  0x4d   :  { %577 = vmatpush.bf16.msrb.mxu2 %v1365_v6  ;;  %v1658_v6 = vld [vmem:[#allocation4 + $0x68] sm:$0xf0]  ;;  %v1733_v13 = vor.u32 %v2020_v10, %v1730_v12  ;;  %v1744_v10 = vld [vmem:[#allocation4 + $0x110] sm:$0xf]  ;;  %v1992_v12 = vld [vmem:[#allocation4 + $0x14] sm:$0xf] }
  0x4e   :  { %595 = vmatpush.bf16.msrb.mxu3 %v1493_v16  ;;  %542 = vmatmul.bf16.vlgmr.msrb.gmra.mxu0 %v2214_v44  ;;  %v1661_v7 = vor.u32 %v2002_v4, %v1658_v6  ;;  %v2000_v16 = vld [vmem:[#allocation4 + $0x54] sm:$0xf] }
  0x4f   :  { %1016 = vmatpush.bf16.msra.mxu0 %v1665_v17  ;;  %560 = vmatmul.bf16.vlgmr.msrb.gmra.mxu1 %v2216_v49  ;;  %v1653_v19 = vor.u32 %v2000_v16, %v1650_v18  ;;  %v2043_v18 = vld [vmem:[#allocation4 + $0x1a4] sm:$0xf0] }
  0x50   :  { %1034 = vmatpush.bf16.msra.mxu1 %v1729_v14  ;;  %578 = vmatmul.bf16.vlgmr.msrb.gmra.mxu2 %v2214_v44  ;;  %v2017_v44 = vld [vmem:[#allocation4 + $0xd4] sm:$0xf0]  ;;  %v1776_v14 = vld [vmem:[#allocation4 + $0x150] sm:$0xf] }
  0x51   :  { %596 = vmatmul.bf16.vlgmr.msrb.gmra.mxu3 %v2216_v49  ;;  %v1713_v31 = vor.u32 %v2017_v44, %v1712_v30  ;;  %v1632_v49 = vld [vmem:[#allocation4 + $0x30] sm:$0xf]  ;;  %1052 = vmatpush.bf16.msra.mxu2 %v1793_v60  ;;  %v1777_v17 = vor.u32 %v2033_v15, %v1776_v14  ;;  %v1769_v30 = vor.u32 %v2031_v28, %v1768_v27  ;;  %v1642_v44 = vld [vmem:[#allocation4 + $0x48] sm:$0xf0]  ;;  %v1618_v14 = vld [vmem:[#allocation4 + $0x18] sm:$0xf0] }
  0x52   :  { %v1633_v34 = vor.u32 %v1997_v33, %v1632_v49  ;;  %1070 = vmatpush.bf16.msra.mxu3 %v1857_v11  ;;  %v1840_v49 = vld [vmem:[#allocation4 + $0x1d0] sm:$0xf]  ;;  %v2049_v33 = vld [vmem:[#allocation4 + $0x1d4] sm:$0xf0]  ;;  %v1621_v16 = vor.u32 %v1992_v12, %v1618_v14  ;;  %v1736_v27 = vld [vmem:[#allocation4 + $0x100] sm:$0xf] }
  0x53   :  { %1017 = vmatpush.bf16.msra.mxu0 %v1657_v22  ;;  %v2018_v22 = vld [vmem:[#allocation4 + $0xe4] sm:$0xf]  ;;  %v2025_v11 = vld [vmem:[#allocation4 + $0x114] sm:$0xf0]  ;;  %v2023_v28 = vld [vmem:[#allocation4 + $0x104] sm:$0xf0] }
  0x54   :  { %1035 = vmatpush.bf16.msra.mxu1 %v1721_v23  ;;  %v2247_v23 = vld [vmem:[%s2341_s2] sm:$0xf]  ;;  %v1850_v14 = vld [vmem:[#allocation4 + $0x1e8] sm:$0xf0] }
  0x55   :  { %1053 = vmatpush.bf16.msra.mxu2 %v1785_v5  ;;  %v2250_v35 = vperm.slane %v2247_v23, 0  ;;  %v1698_v5 = vld [vmem:[#allocation4 + $0xb8] sm:$0xf0] }
  0x56   :  { %1071 = vmatpush.bf16.msra.mxu3 %v1849_v24  ;;  %v1701_v9 = vor.u32 %v2012_v0, %v1698_v5 }
  0x57   :  { %1018 = vmatpush.bf16.msra.mxu0 %v1649_v26  ;;  %v1725_v26 = vor.u32 %v2018_v22, %v1722_v25  ;;  %v1690_v22 = vld [vmem:[#allocation4 + $0xa8] sm:$0xf0] }
  0x58   :  { %1036 = vmatpush.bf16.msra.mxu1 %v1713_v31 }
  0x59   :  { %1054 = vmatpush.bf16.msra.mxu2 %v1777_v17  ;;  %v1816_v17 = vld [vmem:[#allocation4 + $0x1a0] sm:$0xf] }
  0x5a   :  { %v1817_v21 = vor.u32 %v2043_v18, %v1816_v17  ;;  %v2030_v17 = vld [vmem:[#allocation4 + $0x144] sm:$0xf]  ;;  %v1770_v18 = vld [vmem:[#allocation4 + $0x148] sm:$0xf0] }
  0x5b   :  { %1019 = vmatpush.bf16.msra.mxu0 %v1641_v29  ;;  %v1998_v29 = vld [vmem:[#allocation4 + $0x44] sm:$0xf] }
  0x5c   :  { %1037 = vmatpush.bf16.msra.mxu1 %v1705_v38  ;;  %v1645_v31 = vor.u32 %v1998_v29, %v1642_v44  ;;  %v1841_v38 = vor.u32 %v2049_v33, %v1840_v49  ;;  %v1737_v29 = vor.u32 %v2023_v28, %v1736_v27  ;;  %v1610_v44 = vld [vmem:[#allocation4 + $0x8] sm:$0xf0]  ;;  %v136_v27 = vperm.slane %v2247_v23, 2 }
  0x5d   :  { %1055 = vmatpush.bf16.msra.mxu2 %v1769_v30  ;;  %v1990_v30 = vld [vmem:[#allocation4 + $0x4] sm:$0xf] }
  0x5e   :  { %547 = vmatmul.bf16.gmra.mxu0 %v2228_v32  ;;  %1072 = vmatpush.bf16.msra.mxu3 %v1841_v38  ;;  %v1613_v33 = vor.u32 %v1990_v30, %v1610_v44  ;;  %v2008_v38 = vld [vmem:[#allocation4 + $0x94] sm:$0xf]  ;;  %v1762_v44 = vld [vmem:[#allocation4 + $0x138] sm:$0xf0] }
  0x5f   :  { %565 = vmatmul.bf16.gmra.mxu1 %v2230_v37  ;;  %1020 = vmatpush.bf16.msra.mxu0 %v1633_v34  ;;  %v2016_v34 = vld [vmem:[#allocation4 + $0xd4] sm:$0xf] }
  0x60   :  { %583 = vmatmul.bf16.gmra.mxu2 %v2228_v32  ;;  %v1697_v32 = vor.u32 %v2013_v43, %v1696_v42  ;;  %v1760_v42 = vld [vmem:[#allocation4 + $0x130] sm:$0xf]  ;;  %v2029_v43 = vld [vmem:[#allocation4 + $0x134] sm:$0xf0]  ;;  %v2028_v30 = vld [vmem:[#allocation4 + $0x134] sm:$0xf] }
  0x61   :  { %601 = vmatmul.bf16.gmra.mxu3 %v2230_v37  ;;  %v1616_v37 = vld [vmem:[#allocation4 + $0x10] sm:$0xf] }
  0x62   :  { %1038 = vmatpush.bf16.msra.mxu1 %v1697_v32  ;;  %v1617_v46 = vor.u32 %v1993_v45, %v1616_v37  ;;  %v1996_v32 = vld [vmem:[#allocation4 + $0x34] sm:$0xf]  ;;  %v1761_v37 = vor.u32 %v2029_v43, %v1760_v42  ;;  %v1634_v45 = vld [vmem:[#allocation4 + $0x38] sm:$0xf0]  ;;  %1073 = vmatpush.bf16.msra.mxu3 %v1833_v51 }
  0x63   :  { %1021 = vmatpush.bf16.msra.mxu0 %v1625_v41  ;;  %v1717_v41 = vor.u32 %v2016_v34, %v1714_v39  ;;  %v1808_v34 = vld [vmem:[#allocation4 + $0x190] sm:$0xf] }
  0x64   :  { %1056 = vmatpush.bf16.msra.mxu2 %v1761_v37 }
  0x66   :  { %1039 = vmatpush.bf16.msra.mxu1 %v1689_v50  ;;  %v2014_v50 = vld [vmem:[#allocation4 + $0xc4] sm:$0xf] }
  0x67   :  { %1022 = vmatpush.bf16.msra.mxu0 %v1617_v46  ;;  %v1637_v46 = vor.u32 %v1996_v32, %v1634_v45  ;;  %v1709_v54 = vor.u32 %v2014_v50, %v1706_v52  ;;  %v1682_v32 = vld [vmem:[#allocation4 + $0x98] sm:$0xf0]  ;;  %v1800_v52 = vld [vmem:[#allocation4 + $0x180] sm:$0xf] }
  0x68   :  { %v1685_v45 = vor.u32 %v2008_v38, %v1682_v32  ;;  %v1826_v32 = vld [vmem:[#allocation4 + $0x1b8] sm:$0xf0] }
  0x6a   :  { %1040 = vmatpush.bf16.msra.mxu1 %v1681_v56  ;;  %v2027_v56 = vld [vmem:[#allocation4 + $0x124] sm:$0xf0] }
  0x6b   :  { %1023 = vmatpush.bf16.msra.mxu0 %v1609_v53  ;;  %v1753_v57 = vor.u32 %v2027_v56, %v1752_v55 }
  0x6d   :  { %1057 = vmatpush.bf16.msra.mxu2 %v1753_v57 }
  0x6e   :  { %1041 = vmatpush.bf16.msra.mxu1 %v1673_v1  ;;  %v2254_v1 = vperm.slane %v2247_v23, 1 }
  0x6f   :  { %1088 = vmatpush.bf16.msrb.mxu0 %v1669_v62  ;;  %v1824_v62 = vld [vmem:[#allocation4 + $0x1b0] sm:$0xf] }
  0x70   :  { %v1825_v4 = vor.u32 %v2045_v63, %v1824_v62 }
  0x72   :  { %1106 = vmatpush.bf16.msrb.mxu1 %v1733_v13  ;;  %1074 = vmatpush.bf16.msra.mxu3 %v1825_v4  ;;  %v1745_v13 = vor.u32 %v2025_v11, %v1744_v10  ;;  %v1778_v10 = vld [vmem:[#allocation4 + $0x158] sm:$0xf0] }
  0x73   :  { %1089 = vmatpush.bf16.msrb.mxu0 %v1661_v7 }
  0x74   :  { %1058 = vmatpush.bf16.msra.mxu2 %v1745_v13  ;;  %v2050_v13 = vld [vmem:[#allocation4 + $0x1e4] sm:$0xf] }
  0x76   :  { %1107 = vmatpush.bf16.msrb.mxu1 %v1725_v26  ;;  %1075 = vmatpush.bf16.msra.mxu3 %v1817_v21 }
  0x77   :  { %1090 = vmatpush.bf16.msrb.mxu0 %v1653_v19  ;;  %v2010_v19 = vld [vmem:[#allocation4 + $0xa4] sm:$0xf] }
  0x78   :  { %v1693_v26 = vor.u32 %v2010_v19, %v1690_v22  ;;  %1059 = vmatpush.bf16.msra.mxu2 %v1737_v29  ;;  %v1773_v19 = vor.u32 %v2030_v17, %v1770_v18  ;;  %v2048_v22 = vld [vmem:[#allocation4 + $0x1d4] sm:$0xf] }
  0x7a   :  { %1108 = vmatpush.bf16.msrb.mxu1 %v1717_v41 }
  0x7b   :  { %1091 = vmatpush.bf16.msrb.mxu0 %v1645_v31 }
  0x7e   :  { %1109 = vmatpush.bf16.msrb.mxu1 %v1709_v54  ;;  %v2006_v54 = vld [vmem:[#allocation4 + $0x84] sm:$0xf] }
  0x7f   :  { %1092 = vmatpush.bf16.msrb.mxu0 %v1637_v46  ;;  %v2036_v46 = vld [vmem:[#allocation4 + $0x174] sm:$0xf]  ;;  %v1677_v59 = vor.u32 %v2006_v54, %v1674_v58  ;;  %v2022_v58 = vld [vmem:[#allocation4 + $0x104] sm:$0xf] }
  0x80   :  { %v1797_v50 = vor.u32 %v2036_v46, %v1794_v47 }
  0x82   :  { %1110 = vmatpush.bf16.msrb.mxu1 %v1701_v9  ;;  %1124 = vmatpush.bf16.msrb.mxu2 %v1797_v50  ;;  %v2032_v9 = vld [vmem:[#allocation4 + $0x154] sm:$0xf] }
  0x83   :  { %1093 = vmatpush.bf16.msrb.mxu0 %v1629_v61  ;;  %v1786_v61 = vld [vmem:[#allocation4 + $0x168] sm:$0xf0]  ;;  %v1781_v11 = vor.u32 %v2032_v9, %v1778_v10 }
  0x86   :  { %1111 = vmatpush.bf16.msrb.mxu1 %v1693_v26 }
  0x87   :  { %1094 = vmatpush.bf16.msrb.mxu0 %v1621_v16 }
  0x8a   :  { %1112 = vmatpush.bf16.msrb.mxu1 %v1685_v45 }
  0x8b   :  { %1095 = vmatpush.bf16.msrb.mxu0 %v1613_v33  ;;  %v2046_v33 = vld [vmem:[#allocation4 + $0x1c4] sm:$0xf] }
  0x8e   :  { %1113 = vmatpush.bf16.msrb.mxu1 %v1677_v59  ;;  %v1738_v59 = vld [vmem:[#allocation4 + $0x108] sm:$0xf0] }
  0xab   :  { %v471_v36 = vpop.f32.mrf.mxu0 }
  0xac   :  { %v489_v40 = vpop.f32.mrf.mxu1  ;;  %v472_v53 = vadd.f32 %v471_v36, %v2250_v35  ;;  %v2041_v36 = vld [vmem:[#allocation4 + $0x194] sm:$0xf0] }
  0xad   :  { %v1809_v43 = vor.u32 %v2041_v36, %v1808_v34  ;;  %v1834_v34 = vld [vmem:[#allocation4 + $0x1c8] sm:$0xf0]  ;;  %v2026_v36 = vld [vmem:[#allocation4 + $0x124] sm:$0xf] }
  0xae   :  { %v490_v6 = vadd.f32 %v489_v40, %v472_v53  ;;  %v2039_v53 = vld [vmem:[#allocation4 + $0x184] sm:$0xf0]  ;;  %v1837_v38 = vor.u32 %v2046_v33, %v1834_v34 }
  0xaf   :  { %1076 = vmatpush.bf16.msra.mxu3 %v1809_v43  ;;  %v1801_v57 = vor.u32 %v2039_v53, %v1800_v52  ;;  %v2044_v43 = vld [vmem:[#allocation4 + $0x1b4] sm:$0xf]  ;;  %v1746_v52 = vld [vmem:[#allocation4 + $0x118] sm:$0xf0]  ;;  %v2042_v53 = vld [vmem:[#allocation4 + $0x1a4] sm:$0xf] }
  0xb0   :  { %v606_v24 = vmax.f32 %v490_v6, 0.0  ;;  %v1829_v47 = vor.u32 %v2044_v43, %v1826_v32  ;;  %v2059_v34 = vld [vmem:[%s2344_s5 + $0x28] sm:$0xff]  ;;  %v2056_v43 = vld [vmem:[%s2344_s5 + $0x10] sm:$0xff] }
  0xb1   :  { %v2055_v32 = vld [vmem:[%s2344_s5 + $0x8] sm:$0xff] }
  0xb3   :  { %v507_v60 = vpop.f32.mrf.mxu2  ;;  %v473_v3 = vpop.f32.mrf.mxu0  ;;  %1077 = vmatpush.bf16.msra.mxu3 %v1801_v57  ;;  %v1818_v57 = vld [vmem:[#allocation4 + $0x1a8] sm:$0xf0] }
  0xb4   :  { %v525_v2 = vpop.f32.mrf.mxu3  ;;  %v474_v7 = vadd.f32 %v473_v3, %v2250_v35  ;;  %v491_v8 = vpop.f32.mrf.mxu1  ;;  %v508_v20 = vadd.f32 %v507_v60, %v2254_v1  ;;  %v2034_v60 = vld [vmem:[#allocation4 + $0x164] sm:$0xf]  ;;  %v1858_v3 = vld [vmem:[#allocation4 + $0x1f8] sm:$0xf0] }
  0xb5   :  { %v1789_v63 = vor.u32 %v2034_v60, %v1786_v61  ;;  %v1821_v60 = vor.u32 %v2042_v53, %v1818_v57  ;;  %v1810_v61 = vld [vmem:[#allocation4 + $0x198] sm:$0xf0]  ;;  %v2066_v57 = vld [vmem:[%s2344_s5 + $0x60] sm:$0xff] }
  0xb6   :  { %v492_v15 = vadd.f32 %v491_v8, %v474_v7  ;;  %v526_v39 = vadd.f32 %v525_v2, %v508_v20 }
  0xb7   :  { %1125 = vmatpush.bf16.msrb.mxu2 %v1789_v63 }
  0xb8   :  { %v610_v25 = vmax.f32 %v492_v15, 0.0  ;;  %v607_v55 = vmax.f32 %v526_v39, 0.0  ;;  %v1853_v15 = vor.u32 %v2050_v13, %v1850_v14  ;;  %v1754_v39 = vld [vmem:[#allocation4 + $0x128] sm:$0xf0]  ;;  %v2038_v13 = vld [vmem:[#allocation4 + $0x184] sm:$0xf] }
  0xb9   :  { %v1802_v14 = vld [vmem:[#allocation4 + $0x188] sm:$0xf0] }
  0xba   :  { %v2258_v31 = vpack.c.bf16 %v610_v25, %v606_v24 }
  0xbb   :  { %v509_v49 = vpop.f32.mrf.mxu2  ;;  %v476_v42 = vpop.f32.mrf.mxu0  ;;  %1126 = vmatpush.bf16.msrb.mxu2 %v1781_v11 }
  0xbc   :  { %v510_v40 = vadd.f32 %v509_v49, %v2254_v1  ;;  %v527_v41 = vpop.f32.mrf.mxu3  ;;  %v494_v37 = vpop.f32.mrf.mxu1  ;;  %1024 = vmatmul.bf16.vlgmr.msra.gmra.mxu0 %v2258_v31  ;;  %v477_v51 = vadd.f32 %v476_v42, %v2250_v35  ;;  %v2052_v35 = vld [vmem:[#allocation4 + $0x1f4] sm:$0xf]  ;;  %v1765_v49 = vor.u32 %v2028_v30, %v1762_v44 }
  0xbd   :  { %v1861_v6 = vor.u32 %v2052_v35, %v1858_v3 }
  0xbe   :  { %v528_v48 = vadd.f32 %v527_v41, %v510_v40  ;;  %v495_v0 = vadd.f32 %v494_v37, %v477_v51  ;;  %v1757_v40 = vor.u32 %v2026_v36, %v1754_v39  ;;  %v137_v37 = vperm.slane %v2247_v23, 3  ;;  %v2024_v51 = vld [vmem:[#allocation4 + $0x114] sm:$0xf]  ;;  %v2058_v39 = vld [vmem:[%s2344_s5 + $0x20] sm:$0xff] }
  0xbf   :  { %1142 = vmatpush.bf16.msrb.mxu3 %v1861_v6  ;;  %1127 = vmatpush.bf16.msrb.mxu2 %v1773_v19  ;;  %v2040_v23 = vld [vmem:[#allocation4 + $0x194] sm:$0xf] }
  0xc0   :  { %v611_v56 = vmax.f32 %v528_v48, 0.0  ;;  %v614_v12 = vmax.f32 %v495_v0, 0.0  ;;  %v1741_v0 = vor.u32 %v2022_v58, %v1738_v59  ;;  %v2065_v59 = vld [vmem:[%s2344_s5 + $0x58] sm:$0xff] }
  0xc2   :  { %v2263_v62 = vpack.c.bf16 %v611_v56, %v607_v55  ;;  %v2267_v21 = vpack.c.bf16 %v614_v12, %v614_v12  ;;  %v1749_v56 = vor.u32 %v2024_v51, %v1746_v52  ;;  %v2068_v51 = vld [vmem:[%s2344_s5 + $0x70] sm:$0xff]  ;;  %v2067_v52 = vld [vmem:[%s2344_s5 + $0x68] sm:$0xff] }
  0xc3   :  { %v512_v2 = vpop.f32.mrf.mxu2  ;;  %v478_v5 = vpop.f32.mrf.mxu0  ;;  %1143 = vmatpush.bf16.msrb.mxu3 %v1853_v15  ;;  %1128 = vmatpush.bf16.msrb.mxu2 %v1765_v49 }
  0xc4   :  { %v530_v4 = vpop.f32.mrf.mxu3  ;;  %1042 = vmatmul.bf16.vlgmr.msra.gmra.mxu1 %v2263_v62  ;;  %v513_v7 = vadd.f32 %v512_v2, %v2254_v1  ;;  %v496_v8 = vpop.f32.mrf.mxu1  ;;  %v1842_v1 = vld [vmem:[#allocation4 + $0x1d8] sm:$0xf0] }
  0xc5   :  { %v1845_v25 = vor.u32 %v2048_v22, %v1842_v1 }
  0xc6   :  { %v531_v16 = vadd.f32 %v530_v4, %v513_v7  ;;  %v1813_v4 = vor.u32 %v2040_v23, %v1810_v61 }
  0xc7   :  { %1144 = vmatpush.bf16.msrb.mxu3 %v1845_v25  ;;  %1129 = vmatpush.bf16.msrb.mxu2 %v1757_v40  ;;  %v2057_v40 = vld [vmem:[%s2344_s5 + $0x18] sm:$0xff] }
  0xc8   :  { %v615_v26 = vmax.f32 %v531_v16, 0.0  ;;  %v1805_v16 = vor.u32 %v2038_v13, %v1802_v14  ;;  %v2062_v14 = vld [vmem:[%s2344_s5 + $0x40] sm:$0xff] }
  0xca   :  { %v2271_v42 = vpack.c.bf16 %v615_v26, %v615_v26 }
  0xcb   :  { %v514_v20 = vpop.f32.mrf.mxu2  ;;  %v543_v28 = vpop.f32.mrf.mxu0  ;;  %1145 = vmatpush.bf16.msrb.mxu3 %v1837_v38  ;;  %1130 = vmatpush.bf16.msrb.mxu2 %v1749_v56 }
  0xcc   :  { %v532_v24 = vpop.f32.mrf.mxu3  ;;  %v561_v29 = vpop.f32.mrf.mxu1  ;;  %1029 = vmatmul.bf16.gmra.mxu0 %v2267_v21  ;;  %v544_v41 = vadd.f32 %v543_v28, %v136_v27 }
  0xce   :  { %v562_v54 = vadd.f32 %v561_v29, %v544_v41 }
  0xcf   :  { %1146 = vmatpush.bf16.msrb.mxu3 %v1829_v47  ;;  %1131 = vmatpush.bf16.msrb.mxu2 %v1741_v0  ;;  %v2069_v47 = vld [vmem:[%s2344_s5 + $0x78] sm:$0xff] }
  0xd0   :  { %v608_v35 = vmax.f32 %v562_v54, 0.0  ;;  %1320 = vmatpush.bf16.msra.mxu1 %v2069_v47 }
  0xd3   :  { %v579_v45 = vpop.f32.mrf.mxu2  ;;  %v545_v48 = vpop.f32.mrf.mxu0  ;;  %1147 = vmatpush.bf16.msrb.mxu3 %v1821_v60 }
  0xd4   :  { %v597_v46 = vpop.f32.mrf.mxu3  ;;  %1047 = vmatmul.bf16.gmra.mxu1 %v2271_v42  ;;  %v563_v50 = vpop.f32.mrf.mxu1  ;;  %v546_v55 = vadd.f32 %v545_v48, %v136_v27  ;;  %v580_v2 = vadd.f32 %v579_v45, %v137_v37 }
  0xd5   :  { %1321 = vmatpush.bf16.msra.mxu1 %v2068_v51 }
  0xd6   :  { %v564_v63 = vadd.f32 %v563_v50, %v546_v55  ;;  %v598_v8 = vadd.f32 %v597_v46, %v580_v2  ;;  %v2054_v46 = vld [vmem:[%s2344_s5] sm:$0xff]  ;;  %v2064_v2 = vld [vmem:[%s2344_s5 + $0x50] sm:$0xff] }
  0xd7   :  { %1148 = vmatpush.bf16.msrb.mxu3 %v1813_v4  ;;  %v690_v55 = vld [vmem:[%s2343_s4] sm:$0x3] }
  0xd8   :  { %v612_v3 = vmax.f32 %v564_v63, 0.0  ;;  %v609_v17 = vmax.f32 %v598_v8, 0.0  ;;  %v692_v58 = vperm.slane %v690_v55, 0 }
  0xd9   :  { %1322 = vmatpush.bf16.msra.mxu1 %v2067_v52 }
  0xda   :  { %v620_v5 = vpack.c.bf16 %v612_v3, %v608_v35 }
  0xdb   :  { %v581_v6 = vpop.f32.mrf.mxu2  ;;  %v548_v10 = vpop.f32.mrf.mxu0  ;;  %1149 = vmatpush.bf16.msrb.mxu3 %v1805_v16 }
  0xdc   :  { %v599_v7 = vpop.f32.mrf.mxu3  ;;  %v582_v9 = vadd.f32 %v581_v6, %v137_v37  ;;  %1096 = vmatmul.bf16.vlgmr.msrb.gmra.mxu0 %v2258_v31  ;;  %v566_v11 = vpop.f32.mrf.mxu1  ;;  %1060 = vmatmul.bf16.vlgmr.msra.gmra.mxu2 %v620_v5  ;;  %v549_v12 = vadd.f32 %v548_v10, %v136_v27  ;;  %v2063_v6 = vld [vmem:[%s2344_s5 + $0x48] sm:$0xff] }
  0xdd   :  { %1323 = vmatpush.bf16.msra.mxu1 %v2066_v57 }
  0xde   :  { %v600_v15 = vadd.f32 %v599_v7, %v582_v9  ;;  %v567_v19 = vadd.f32 %v566_v11, %v549_v12 }
  0xe0   :  { %v613_v18 = vmax.f32 %v600_v15, 0.0  ;;  %v616_v26 = vmax.f32 %v567_v19, 0.0 }
  0xe1   :  { %1324 = vmatpush.bf16.msra.mxu1 %v2065_v59 }
  0xe2   :  { %v621_v20 = vpack.c.bf16 %v613_v18, %v609_v17  ;;  %v624_v28 = vpack.c.bf16 %v616_v26, %v616_v26 }
  0xe3   :  { %v584_v22 = vpop.f32.mrf.mxu2  ;;  %v550_v31 = vpop.f32.mrf.mxu0 }
  0xe4   :  { %1114 = vmatmul.bf16.vlgmr.msrb.gmra.mxu1 %v2263_v62  ;;  %v602_v1 = vpop.f32.mrf.mxu3  ;;  %v585_v24 = vadd.f32 %v584_v22, %v137_v37  ;;  %1078 = vmatmul.bf16.vlgmr.msra.gmra.mxu3 %v621_v20  ;;  %v568_v25 = vpop.f32.mrf.mxu1  ;;  %v2061_v62 = vld [vmem:[%s2344_s5 + $0x38] sm:$0xff] }
  0xe5   :  { %1302 = vmatpush.bf16.msra.mxu0 %v2061_v62  ;;  %2075 = vmatpush.bf16.msra.mxu2 %v2061_v62 }
  0xe6   :  { %v603_v27 = vadd.f32 %v602_v1, %v585_v24  ;;  %2083 = vmatpush.bf16.msra.mxu3 %v2069_v47  ;;  %1325 = vmatpush.bf16.msra.mxu1 %v2064_v2 }
  0xe8   :  { %v617_v44 = vmax.f32 %v603_v27, 0.0 }
  0xea   :  { %v625_v49 = vpack.c.bf16 %v617_v44, %v617_v44  ;;  %2084 = vmatpush.bf16.msra.mxu3 %v2068_v51  ;;  %1326 = vmatpush.bf16.msra.mxu1 %v2063_v6 }
  0xeb   :  { %v586_v29 = vpop.f32.mrf.mxu2 }
  0xec   :  { %v604_v30 = vpop.f32.mrf.mxu3  ;;  %1101 = vmatmul.bf16.gmra.mxu0 %v2267_v21  ;;  %1065 = vmatmul.bf16.gmra.mxu2 %v624_v28  ;;  %v2060_v21 = vld [vmem:[%s2344_s5 + $0x30] sm:$0xff]  ;;  %v693_v29 = vperm.slane %v690_v55, 1 }
  0xed   :  { %1303 = vmatpush.bf16.msra.mxu0 %v2060_v21  ;;  %2076 = vmatpush.bf16.msra.mxu2 %v2060_v21 }
  0xee   :  { %2085 = vmatpush.bf16.msra.mxu3 %v2067_v52  ;;  %1327 = vmatpush.bf16.msra.mxu1 %v2062_v14 }
  0xf1   :  { %1304 = vmatpush.bf16.msra.mxu0 %v2059_v34  ;;  %2077 = vmatpush.bf16.msra.mxu2 %v2059_v34 }
  0xf2   :  { %2086 = vmatpush.bf16.msra.mxu3 %v2066_v57 }
  0xf4   :  { %1119 = vmatmul.bf16.gmra.mxu1 %v2271_v42  ;;  %1083 = vmatmul.bf16.gmra.mxu3 %v625_v49 }
  0xf5   :  { %1305 = vmatpush.bf16.msra.mxu0 %v2058_v39  ;;  %2078 = vmatpush.bf16.msra.mxu2 %v2058_v39 }
  0xf6   :  { %2087 = vmatpush.bf16.msra.mxu3 %v2065_v59 }
  0xf9   :  { %1306 = vmatpush.bf16.msra.mxu0 %v2057_v40  ;;  %2079 = vmatpush.bf16.msra.mxu2 %v2057_v40 }
  0xfa   :  { %2088 = vmatpush.bf16.msra.mxu3 %v2064_v2 }
  0xfc   :  { %1132 = vmatmul.bf16.vlgmr.msrb.gmra.mxu2 %v620_v5 }
  0xfd   :  { %1307 = vmatpush.bf16.msra.mxu0 %v2056_v43  ;;  %2080 = vmatpush.bf16.msra.mxu2 %v2056_v43 }
  0xfe   :  { %2089 = vmatpush.bf16.msra.mxu3 %v2063_v6 }
 0x101   :  { %1308 = vmatpush.bf16.msra.mxu0 %v2055_v32  ;;  %2081 = vmatpush.bf16.msra.mxu2 %v2055_v32 }
 0x102   :  { %2090 = vmatpush.bf16.msra.mxu3 %v2062_v14 }
 0x104   :  { %1150 = vmatmul.bf16.vlgmr.msrb.gmra.mxu3 %v621_v20 }
 0x105   :  { %1309 = vmatpush.bf16.msra.mxu0 %v2054_v46  ;;  %2082 = vmatpush.bf16.msra.mxu2 %v2054_v46 }
 0x10c   :  { %1137 = vmatmul.bf16.gmra.mxu2 %v624_v28 }
 0x114   :  { %1155 = vmatmul.bf16.gmra.mxu3 %v625_v49 }
 0x139   :  { %v1025_v33 = vpop.f32.mrf.mxu0 }
 0x13a   :  { %v1026_v23 = vadd.f32 %v1025_v33, %v692_v58 }
 0x141   :  { %v1043_v36 = vpop.f32.mrf.mxu1  ;;  %v1027_v38 = vpop.f32.mrf.mxu0 }
 0x142   :  { %v1044_v35 = vadd.f32 %v1043_v36, %v1026_v23  ;;  %v1028_v3 = vadd.f32 %v1027_v38, %v692_v58 }
 0x149   :  { %v1045_v41 = vpop.f32.mrf.mxu1  ;;  %v1030_v42 = vpop.f32.mrf.mxu0 }
 0x14a   :  { %v1046_v4 = vadd.f32 %v1045_v41, %v1028_v3  ;;  %v1031_v15 = vadd.f32 %v1030_v42, %v692_v58  ;;  %v2097_v58 = vld [vmem:[%s2345_s6] ss:$0 sm:$0xff] }
 0x151   :  { %v1048_v37 = vpop.f32.mrf.mxu1  ;;  %v1032_v45 = vpop.f32.mrf.mxu0 }
 0x152   :  { %v1049_v18 = vadd.f32 %v1048_v37, %v1031_v15 }
 0x159   :  { %v1050_v48 = vpop.f32.mrf.mxu1  ;;  %v1097_v50 = vpop.f32.mrf.mxu0 }
 0x15a   :  { %v1098_v44 = vadd.f32 %v1097_v50, %v693_v29 }
 0x15f   :  { %v1061_v53 = vpop.f32.mrf.mxu2 }
 0x160   :  { %v1062_v5 = vadd.f32 %v1061_v53, %v1044_v35 }
 0x161   :  { %v1115_v54 = vpop.f32.mrf.mxu1  ;;  %v1099_v56 = vpop.f32.mrf.mxu0 }
 0x162   :  { %v1116_v62 = vadd.f32 %v1115_v54, %v1098_v44  ;;  %v1100_v33 = vadd.f32 %v1099_v56, %v693_v29 }
 0x167   :  { %v1079_v60 = vpop.f32.mrf.mxu3  ;;  %v1063_v61 = vpop.f32.mrf.mxu2 }
 0x168   :  { %v1080_v7 = vadd.f32 %v1079_v60, %v1062_v5  ;;  %v1064_v8 = vadd.f32 %v1063_v61, %v1046_v4 }
 0x169   :  { %v1117_v63 = vpop.f32.mrf.mxu1  ;;  %v1102_v0 = vpop.f32.mrf.mxu0 }
 0x16a   :  { %v1160_v16 = vmax.f32 %v1080_v7, 0.0  ;;  %v1118_v21 = vadd.f32 %v1117_v63, %v1100_v33  ;;  %v1103_v42 = vadd.f32 %v1102_v0, %v693_v29 }
 0x16f   :  { %v1081_v9 = vpop.f32.mrf.mxu3  ;;  %v1066_v11 = vpop.f32.mrf.mxu2 }
 0x170   :  { %v1082_v10 = vadd.f32 %v1081_v9, %v1064_v8  ;;  %v1067_v20 = vadd.f32 %v1066_v11, %v1049_v18 }
 0x171   :  { %v1120_v12 = vpop.f32.mrf.mxu1  ;;  %v1104_v13 = vpop.f32.mrf.mxu0 }
 0x172   :  { %v1162_v17 = vmax.f32 %v1082_v10, 0.0  ;;  %v1121_v37 = vadd.f32 %v1120_v12, %v1103_v42 }
 0x174   :  { %v1166_v19 = vpack.c.bf16 %v1162_v17, %v1160_v16 }
 0x176   :  { %1310 = vmatmul.bf16.vlgmr.msra.gmra.mxu0 %v1166_v19 }
 0x177   :  { %v1084_v22 = vpop.f32.mrf.mxu3  ;;  %v1068_v24 = vpop.f32.mrf.mxu2 }
 0x178   :  { %v1085_v1 = vadd.f32 %v1084_v22, %v1067_v20 }
 0x179   :  { %v1122_v31 = vpop.f32.mrf.mxu1 }
 0x17a   :  { %v1164_v25 = vmax.f32 %v1085_v1, 0.0 }
 0x17c   :  { %v1168_v26 = vpack.c.bf16 %v1164_v25, %v1164_v25 }
 0x17e   :  { %1315 = vmatmul.bf16.vlgmr.msra.gmra.mxu2 %v1168_v26 }
 0x17f   :  { %v1086_v27 = vpop.f32.mrf.mxu3  ;;  %v1133_v28 = vpop.f32.mrf.mxu2 }
 0x180   :  { %v1134_v34 = vadd.f32 %v1133_v28, %v1116_v62 }
 0x187   :  { %v1151_v30 = vpop.f32.mrf.mxu3  ;;  %v1135_v49 = vpop.f32.mrf.mxu2 }
 0x188   :  { %v1152_v36 = vadd.f32 %v1151_v30, %v1134_v34  ;;  %v1136_v38 = vadd.f32 %v1135_v49, %v1118_v21 }
 0x18a   :  { %v1161_v43 = vmax.f32 %v1152_v36, 0.0 }
 0x18f   :  { %v1153_v39 = vpop.f32.mrf.mxu3  ;;  %v1138_v41 = vpop.f32.mrf.mxu2 }
 0x190   :  { %v1154_v40 = vadd.f32 %v1153_v39, %v1136_v38  ;;  %v1139_v46 = vadd.f32 %v1138_v41, %v1121_v37 }
 0x192   :  { %v1163_v32 = vmax.f32 %v1154_v40, 0.0 }
 0x194   :  { %v1167_v45 = vpack.c.bf16 %v1163_v32, %v1161_v43 }
 0x196   :  { %1328 = vmatmul.bf16.vlgmr.msra.gmra.mxu1 %v1167_v45 }
 0x197   :  { %v1156_v47 = vpop.f32.mrf.mxu3  ;;  %v1140_v50 = vpop.f32.mrf.mxu2 }
 0x198   :  { %v1157_v48 = vadd.f32 %v1156_v47, %v1139_v46 }
 0x19a   :  { %v1165_v51 = vmax.f32 %v1157_v48, 0.0 }
 0x19c   :  { %v1169_v52 = vpack.c.bf16 %v1165_v51, %v1165_v51 }
 0x19e   :  { %1333 = vmatmul.bf16.vlgmr.msra.gmra.mxu3 %v1169_v52 }
 0x19f   :  { %v1158_v53 = vpop.f32.mrf.mxu3 }
 0x1f3   :  { %v1311_v56 = vpop.f32.mrf.mxu0 }
 0x1f4   :  { %v1312_v60 = vadd.f32 %v2097_v58, %v1311_v56 }
 0x1fb   :  { %v1313_v59 = vpop.f32.mrf.mxu0 }
 0x1fc   :  { %v1314_v23 = vadd.f32 %v2097_v58, %v1313_v59 }
 0x201   :  { %v1316_v54 = vpop.f32.mrf.mxu2 }
 0x202   :  { %v1317_v35 = vadd.f32 %v2097_v58, %v1316_v54 }
 0x209   :  { %v1318_v55 = vpop.f32.mrf.mxu2 }
 0x213   :  { %v1329_v57 = vpop.f32.mrf.mxu1 }
 0x214   :  { %v1330_v63 = vadd.f32 %v1329_v57, %v1312_v60 }
 0x21b   :  { %v1331_v61 = vpop.f32.mrf.mxu1 }
 0x21c   :  { %v1332_v0 = vadd.f32 %v1331_v61, %v1314_v23 }
 0x21e   :  { %v2073_v2 = vpack.c.bf16 %v1332_v0, %v1330_v63 }
 0x220   :  { %2074 = vst [vmem:[%s2346_s7] sm:$0xff] %v2073_v2  }
 0x221   :  { %v1334_v3 = vpop.f32.mrf.mxu3 }
 0x222   :  { %v1335_v4 = vadd.f32 %v1334_v3, %v1317_v35 }
 0x224   :  { %v1340_v5 = vpack.c.bf16 %v1335_v4, %v1335_v4 }
 0x226   :  { %1343 = vst [vmem:[%s2346_s7 + $0x8] sm:$0xf] %v1340_v5 }
 0x229   :  { %v1336_v6 = vpop.f32.mrf.mxu3 }
 0x22a   :  { %1348 = vsyncpa [#allocation3], 1 }
 0x22b   :  { %1349 = vsyncpa [#allocation5], 1 }

</bundles_post_ra>
